<compile_context>
chip_gen: v6e
topology: v6e:2x2x1
jax: 0.10.0
libtpu: 0.0.40
codegen_flags: <defaults>
</compile_context>

<pallas_src>
import jax
import jax.numpy as jnp
from jax.experimental import pallas as pl
from jax.experimental.pallas import tpu as pltpu


def _round_up(x: int, m: int) -> int:
    return ((x + m - 1) // m) * m


def _tm_cap() -> int:
    """Batch-tile cap: 128-row tiles on v5e (4x128^2 MXU), 256 on v6e/v7x."""
    try:
        kind = jax.devices()[0].device_kind.lower()
        if "v5" in kind:
            return 128
    except Exception:
        pass
    return 256


def _raster_head_kernel(x_ref, w_ref, b_ref, o_ref):
    """One (tm, N_pad) output tile; accumulates over the K grid axis.

    x_ref: (tm, tk)    bf16  VMEM
    w_ref: (tk, N_pad) bf16  VMEM
    b_ref: (1, N_pad)  f32   VMEM
    o_ref: (tm, N_pad) f32   VMEM (resident across the K axis -> accumulator)
    """
    k = pl.program_id(1)

    @pl.when(k == 0)
    def _init():
        # Bias folded into the accumulator init (hoisted out of the K loop).
        o_ref[...] = jnp.broadcast_to(b_ref[...], o_ref.shape)

    o_ref[...] += jnp.dot(x_ref[...], w_ref[...],
                          preferred_element_type=jnp.float32)


def raster_model_forward(x_nchw, W, b, *, modes: int, future_len: int):
    """Pallas-backed equivalent of RasterModel.forward.

    Returns (pred, conf):
      pred: (bs, modes, future_len, 2) float32
      conf: (bs, modes)                float32 (softmaxed, or ones if modes==1)
    """
    bs = x_nchw.shape[0]
    num_preds = modes * 2 * future_len
    out_dim = num_preds + (modes if modes != 1 else 0)
    assert W.shape[1] == out_dim

    x_flat = x_nchw.reshape(bs, -1)
    feat = x_flat.shape[1]

    # ---- tiling / padding -------------------------------------------------
    n_pad = _round_up(out_dim, 128)           # lane-dense output slab
    k_pad = _round_up(feat, 128)
    TK_MAX = 2048                              # bf16: 2*tk*128*2B per W buffer
    if k_pad <= TK_MAX:
        tk = k_pad                             # toy sizes: single K step
    else:
        tk = TK_MAX
        k_pad = _round_up(k_pad, tk)
    tm = min(_round_up(bs, 8), _tm_cap())
    m_pad = _round_up(bs, tm)

    # ---- pad + cast: bf16 MXU operands, f32 bias --------------------------
    xb = jnp.zeros((m_pad, k_pad), jnp.bfloat16)
    xb = xb.at[:bs, :feat].set(x_flat.astype(jnp.bfloat16))
    Wb = jnp.zeros((k_pad, n_pad), jnp.bfloat16)
    Wb = Wb.at[:feat, :out_dim].set(W.astype(jnp.bfloat16))
    b2 = jnp.zeros((1, n_pad), jnp.float32)
    b2 = b2.at[0, :out_dim].set(b.astype(jnp.float32))

    grid = (m_pad // tm, k_pad // tk)

    res_pad = pl.pallas_call(
        _raster_head_kernel,
        out_shape=jax.ShapeDtypeStruct((m_pad, n_pad), jnp.float32),
        grid=grid,
        in_specs=[
            pl.BlockSpec((tm, tk), lambda i, k: (i, k)),      # x tile
            pl.BlockSpec((tk, n_pad), lambda i, k: (k, 0)),   # W tile
            pl.BlockSpec((1, n_pad), lambda i, k: (0, 0)),    # bias
        ],
        out_specs=pl.BlockSpec((tm, n_pad), lambda i, k: (i, 0)),
        compiler_params=pltpu.CompilerParams(
            dimension_semantics=("parallel", "arbitrary"),
            vmem_limit_bytes=32 * 1024 * 1024,
        ),
    )(xb, Wb, b2)

    # ---- post-processing (module semantics) -------------------------------
    res = res_pad[:bs, :out_dim]
    pred = res[:, :num_preds].reshape(bs, modes, future_len, 2)
    if modes != 1:
        conf = jax.nn.softmax(res[:, num_preds:], axis=1)
    else:
        # res.new_ones((bs, 1)) -- constant, no kernel store needed.
        conf = jnp.ones((bs, 1), jnp.float32)
    return pred, conf


def make_params(key, feat_dim: int, modes: int, future_len: int):
    """Deterministic synthetic parameters for the linear head."""
    num_preds = modes * 2 * future_len
    out_dim = num_preds + (modes if modes != 1 else 0)
    kw, kb = jax.random.split(key)
    W = jax.random.normal(kw, (feat_dim, out_dim), jnp.float32) * 0.02
    b = jax.random.normal(kb, (out_dim,), jnp.float32) * 0.01
    return W, b


if __name__ == "__main__":
    key = jax.random.PRNGKey(0)

    # config-implied small shapes:
    #   history_num_frames = 1 -> in_channels = (1+1)*2 + 3 = 7
    #   future_num_frames=16, future_step_size=2 -> future_len = 8
    bs, in_channels, H, Wd = 2, 7, 16, 16
    future_len = 8

    kx, kp1, kp2 = jax.random.split(key, 3)
    x = jax.random.normal(kx, (bs, in_channels, H, Wd), jnp.float32)
    feat_dim = in_channels * H * Wd

    # bf16-consistent reference inputs (kernel uses bf16 operands + f32 accum)
    x_ref_f = x.reshape(bs, -1).astype(jnp.bfloat16).astype(jnp.float32)

    # --- modes != 1 path (softmax confidences) ---
    modes = 3
    W3, b3 = make_params(kp1, feat_dim, modes, future_len)
    pred3, conf3 = raster_model_forward(x, W3, b3, modes=modes,
                                        future_len=future_len)
    jax.block_until_ready((pred3, conf3))
    assert pred3.shape == (bs, modes, future_len, 2)
    assert conf3.shape == (bs, modes)
    assert jnp.allclose(jnp.sum(conf3, axis=1), 1.0, atol=1e-5)

    W3_f = W3.astype(jnp.bfloat16).astype(jnp.float32)
    res_ref = x_ref_f @ W3_f + b3
    num_preds3 = modes * 2 * future_len
    pred_ref = res_ref[:, :num_preds3].reshape(bs, modes, future_len, 2)
    conf_ref = jax.nn.softmax(res_ref[:, num_preds3:], axis=1)
    assert jnp.allclose(pred3, pred_ref, atol=2e-3, rtol=1e-3)
    assert jnp.allclose(conf3, conf_ref, atol=1e-4)

    # --- modes == 1 path (ones confidences) ---
    modes = 1
    W1, b1 = make_params(kp2, feat_dim, modes, future_len)
    pred1, conf1 = raster_model_forward(x, W1, b1, modes=modes,
                                        future_len=future_len)
    jax.block_until_ready((pred1, conf1))
    assert pred1.shape == (bs, 1, future_len, 2)
    assert conf1.shape == (bs, 1)
    assert jnp.allclose(conf1, jnp.ones((bs, 1)))
    W1_f = W1.astype(jnp.bfloat16).astype(jnp.float32)
    res_ref1 = x_ref_f @ W1_f + b1
    assert jnp.allclose(pred1, res_ref1.reshape(bs, 1, future_len, 2),
                        atol=2e-3, rtol=1e-3)

    print("KERNEL_OK")
</pallas_src>

<mosaic_0001>
module attributes {stable_mosaic.version = 11 : i64} {
  func.func @_raster_head_kernel(%arg0: i32, %arg1: i32, %arg2: memref<8x1792xbf16, #tpu.memory_space<vmem>>, %arg3: memref<1792x128xbf16, #tpu.memory_space<vmem>>, %arg4: memref<1x128xf32, #tpu.memory_space<vmem>>, %arg5: memref<8x128xf32, #tpu.memory_space<vmem>>) attributes {dimension_semantics = [#tpu.dimension_semantics<parallel>, #tpu.dimension_semantics<arbitrary>], iteration_bounds = array<i64: 1, 1>, scalar_prefetch = 0 : i64, scratch_operands = 0 : i64, tpu.core_type = #tpu.core_type<tc>, window_params = [{transform_indices = @transform_0, window_bounds = array<i64: 8, 1792>}, {transform_indices = @transform_1, window_bounds = array<i64: 1792, 128>}, {pipeline_mode = #tpu.pipeline_mode<synchronous>, transform_indices = @transform_2, window_bounds = array<i64: 1, 128>}, {transform_indices = @transform_3, window_bounds = array<i64: 8, 128>}]} {
    %c0_i32 = arith.constant 0 : i32
    %0 = arith.cmpi eq, %arg1, %c0_i32 : i32
    %1 = arith.extui %0 : i1 to i32
    %c0_i32_0 = arith.constant 0 : i32
    %2 = arith.cmpi ne, %1, %c0_i32_0 : i32
    scf.if %2 {
      %c0_8 = arith.constant 0 : index
      %c0_9 = arith.constant 0 : index
      %9 = vector.load %arg4[%c0_8, %c0_9] : memref<1x128xf32, #tpu.memory_space<vmem>>, vector<1x128xf32>
      %10 = vector.shape_cast %9 : vector<1x128xf32> to vector<1x128xf32>
      %11 = vector.broadcast %10 : vector<1x128xf32> to vector<8x128xf32>
      %c0_10 = arith.constant 0 : index
      %c0_11 = arith.constant 0 : index
      %12 = vector.load %arg5[%c0_10, %c0_11] : memref<8x128xf32, #tpu.memory_space<vmem>>, vector<8x128xf32>
      tpu.vector_store %arg5[%c0_10, %c0_11], %11 {strides = array<i32>} : memref<8x128xf32, #tpu.memory_space<vmem>>, vector<8x128xf32>,
    } else {
    }
    %c0 = arith.constant 0 : index
    %c0_1 = arith.constant 0 : index
    %3 = vector.load %arg5[%c0, %c0_1] : memref<8x128xf32, #tpu.memory_space<vmem>>, vector<8x128xf32>
    %c0_2 = arith.constant 0 : index
    %c0_3 = arith.constant 0 : index
    %4 = vector.load %arg2[%c0_2, %c0_3] : memref<8x1792xbf16, #tpu.memory_space<vmem>>, vector<8x1792xbf16>
    %c0_4 = arith.constant 0 : index
    %c0_5 = arith.constant 0 : index
    %5 = vector.load %arg3[%c0_4, %c0_5] : memref<1792x128xbf16, #tpu.memory_space<vmem>>, vector<1792x128xbf16>
    %cst = arith.constant dense<0.000000e+00> : vector<8x128xf32>
    %6 = tpu.matmul %4, %5, %cst {dimension_numbers = #tpu.dot_dimension_numbers<[1], [0], [0], [1], [0, 0, 1, 1], [], []>} : vector<8x1792xbf16>, vector<1792x128xbf16>, vector<8x128xf32> -> vector<8x128xf32>
    %7 = arith.addf %3, %6 : vector<8x128xf32>
    %c0_6 = arith.constant 0 : index
    %c0_7 = arith.constant 0 : index
    %8 = vector.load %arg5[%c0_6, %c0_7] : memref<8x128xf32, #tpu.memory_space<vmem>>, vector<8x128xf32>
    tpu.vector_store %arg5[%c0_6, %c0_7], %7 {strides = array<i32>} : memref<8x128xf32, #tpu.memory_space<vmem>>, vector<8x128xf32>,
    return
  }
  func.func @transform_0(%arg0: i32, %arg1: i32) -> (i32, i32) {
    %c0_i32 = arith.constant 0 : i32
    return %arg0, %arg1 : i32, i32
  }
  func.func @transform_1(%arg0: i32, %arg1: i32) -> (i32, i32) {
    %c0_i32 = arith.constant 0 : i32
    %c0_i32_0 = arith.constant 0 : i32
    return %arg1, %c0_i32 : i32, i32
  }
  func.func @transform_2(%arg0: i32, %arg1: i32) -> (i32, i32) {
    %c0_i32 = arith.constant 0 : i32
    %c0_i32_0 = arith.constant 0 : i32
    %c0_i32_1 = arith.constant 0 : i32
    return %c0_i32, %c0_i32_0 : i32, i32
  }
  func.func @transform_3(%arg0: i32, %arg1: i32) -> (i32, i32) {
    %c0_i32 = arith.constant 0 : i32
    %c0_i32_0 = arith.constant 0 : i32
    return %arg0, %c0_i32 : i32, i32
  }
}

</mosaic_0001>

<bundles_post_ra>
// kernel: tpu_custom_call.1
= control target key start
LH: loop header
LB: loop body
LE: loop exit
PB: predicated region body
PF: predicated region fallthrough
CT: control target
= control target key end

     0   :  { %8 = vsyncpa [#allocation3], 0  ;;  %s1820_s0 = inlined_call_operand.hbm [shape: bf16[8,1792], index: 0, kind: input, shape index: {}]   ;;  %s1821_s1 = inlined_call_operand.hbm [shape: bf16[1792,128], index: 1, kind: input, shape index: {}]   ;;  %s1822_s2 = inlined_call_operand.vmem [shape: f32[1,128], index: 2, kind: input, shape index: {}]   ;;  %s1823_s3 = inlined_call_operand.hbm [shape: f32[8,128], index: 3, kind: output, shape index: {}]  }
   0x1   :  { %9 = vsyncpa [#allocation6], 0 }
   0x2   :  { %10 = vsyncpa [#allocation4], 0  ;;  %s1783_s12 = smov [#allocation2]   ;;  %s1784_s14 = smov [#allocation5]  }
   0x3   :  { %s17_s13 = sshll.u32 %s1783_s12, 4  ;;  %s26_s15 = sshll.u32 %s1784_s14, 4  ;;  %s18_s13 = int_to_ptr.vmem [resolvable:$true] %s17_s13  ;;  %s27_s15 = int_to_ptr.vmem [resolvable:$true] %s26_s15 }
   0x4   :  { %s1725_s16 = scalar_lea.vmem %s18_s13, 896  ;;  %p1730_p1 = scmp.lt.s32.totalorder %s18_s13, %s18_s13 }
   0x5   :  { %p1726_p0 = scmp.ne.s32.totalorder %s18_s13, %s1725_s16  ;;  %p1731_p2 = scmp.lt.s32.totalorder %s1725_s16, %s1725_s16 }
   0x7   :  { %p1732_p3 = por %p1731_p2, %p1730_p1 }
   0x9   :  { %p1733_p4 = pnand %p1732_p3, %p1726_p0 }
   0xb   :  { %1736 = shalt.err (!%p1733_p4)
}
   0xc   :  { %20 = dma.hbm_to_vmem [thread:$0]  %s1820_s0, 896, %s18_s13, [#allocation3]  }
   0xd   :  { %s1745_s19 = scalar_lea.vmem %s27_s15, 14336  ;;  %p1750_p6 = scmp.lt.s32.totalorder %s27_s15, %s27_s15 }
   0xe   :  { %p1746_p5 = scmp.ne.s32.totalorder %s27_s15, %s1745_s19  ;;  %p1751_p7 = scmp.lt.s32.totalorder %s1745_s19, %s1745_s19 }
  0x10   :  { %p1752_p8 = por %p1751_p7, %p1750_p6 }
  0x12   :  { %p1753_p9 = pnand %p1752_p8, %p1746_p5 }
  0x14   :  { %1756 = shalt.err (!%p1753_p9)
}
  0x15   :  { %s1785_s20 = smov 64   ;;  %s1786_s21 = smov 4  }
  0x16   :  { %32 = dma.hbm_to_vmem [thread:$0]  %s1821_s1, 14336, %s27_s15, [#allocation6], %s1785_s20, %s1785_s20, %s1786_s21  }
  0x17   :  { %1777 = dma.done.wait [#allocation3], 896  }
  0x18   :  { %1778 = vsyncadd [#allocation3], 4294966400 }
  0x19   :  { %1779 = dma.done.wait [#allocation6], 14336  }
  0x1a   :  { %1780 = vsyncadd [#allocation6], 4294952960  ;;  %v1591_v0 = vld [vmem:[#allocation5 + $0x78] sm:$0xff]   ;;  %v1595_v4 = vld [vmem:[#allocation5 + $0x70] sm:$0xff]   ;;  %s1787_s24 = smov [#allocation7]  }
  0x1b   :  { %v1592_v1 = vld [vmem:[#allocation5 + $0xf8] sm:$0xff]   ;;  %1432 = vmatprep.subr.bf16.mxu0 %v1591_v0  ;;  %v1596_v5 = vld [vmem:[#allocation5 + $0xf0] sm:$0xff]   ;;  %v1599_v8 = vld [vmem:[#allocation5 + $0x68] sm:$0xff]   ;;  %s1295_s25 = sshll.u32 %s1787_s24, 4  ;;  %s1296_s25 = int_to_ptr.vmem [resolvable:$true] %s1295_s25 }
  0x1c   :  { %v1593_v2 = vld [vmem:[#allocation5 + $0x38] sm:$0xff]   ;;  %1454 = vmatprep.subr.bf16.mxu1 %v1592_v1  ;;  %v1597_v6 = vld [vmem:[#allocation5 + $0x30] sm:$0xff]   ;;  %v1600_v9 = vld [vmem:[#allocation5 + $0xe8] sm:$0xff]   ;;  %s1757_s26 = scalar_lea.vmem %s1296_s25, 128  ;;  %p1762_p11 = scmp.lt.s32.totalorder %s1296_s25, %s1296_s25 }
  0x1d   :  { %v1594_v3 = vld [vmem:[#allocation5 + $0xb8] sm:$0xff]   ;;  %1433 = vmatpush3.bf16.msra.mxu0 %v1593_v2  ;;  %v1598_v7 = vld [vmem:[#allocation5 + $0xb0] sm:$0xff]   ;;  %v1601_v10 = vld [vmem:[#allocation5 + $0x28] sm:$0xff]   ;;  %p1758_p10 = scmp.ne.s32.totalorder %s1296_s25, %s1757_s26  ;;  %p1763_p12 = scmp.lt.s32.totalorder %s1757_s26, %s1757_s26 }
  0x1e   :  { %1455 = vmatpush3.bf16.msra.mxu1 %v1594_v3  ;;  %1434 = vmatprep.subr.bf16.mxu0 %v1595_v4  ;;  %v1602_v11 = vld [vmem:[#allocation5 + $0xa8] sm:$0xff]   ;;  %v1603_v12 = vld [vmem:[#allocation5 + $0x60] sm:$0xff]   ;;  %v1607_v16 = vld [vmem:[#allocation5 + $0x58] sm:$0xff]  }
  0x1f   :  { %1456 = vmatprep.subr.bf16.mxu1 %v1596_v5  ;;  %v1604_v13 = vld [vmem:[#allocation5 + $0xe0] sm:$0xff]   ;;  %v1608_v17 = vld [vmem:[#allocation5 + $0xd8] sm:$0xff]   ;;  %v1611_v20 = vld [vmem:[#allocation5 + $0x50] sm:$0xff]   ;;  %p1764_p13 = por %p1763_p12, %p1762_p11 }
  0x20   :  { %v1605_v14 = vld [vmem:[#allocation5 + $0x20] sm:$0xff]   ;;  %v1609_v18 = vld [vmem:[#allocation5 + $0x18] sm:$0xff]   ;;  %v1612_v21 = vld [vmem:[#allocation5 + $0xd0] sm:$0xff]  }
  0x21   :  { %1435 = vmatpush3.bf16.msra.mxu0 %v1597_v6  ;;  %v1606_v15 = vld [vmem:[#allocation5 + $0xa0] sm:$0xff]   ;;  %v1610_v19 = vld [vmem:[#allocation5 + $0x98] sm:$0xff]   ;;  %v1613_v22 = vld [vmem:[#allocation5 + $0x10] sm:$0xff]   ;;  %p1765_p0 = pnand %p1764_p13, %p1758_p10 }
  0x22   :  { %1457 = vmatpush3.bf16.msra.mxu1 %v1598_v7  ;;  %1436 = vmatprep.subr.bf16.mxu0 %v1599_v8  ;;  %v1614_v23 = vld [vmem:[#allocation5 + $0x90] sm:$0xff]   ;;  %v1615_v24 = vld [vmem:[#allocation5 + $0x48] sm:$0xff]   ;;  %v1619_v28 = vld [vmem:[#allocation5 + $0x40] sm:$0xff]  }
  0x23   :  { %1458 = vmatprep.subr.bf16.mxu1 %v1600_v9  ;;  %v1616_v25 = vld [vmem:[#allocation5 + $0xc8] sm:$0xff]   ;;  %v1620_v29 = vld [vmem:[#allocation5 + $0xc0] sm:$0xff]   ;;  %v56_v33 = vld [vmem:[#allocation2 + $0x8] sm:$0xff] }
  0x24   :  { %v1617_v26 = vld [vmem:[#allocation5 + $0x8] sm:$0xff]   ;;  %v1621_v30 = vld [vmem:[#allocation5] sm:$0xff]   ;;  %v1308_v36 = vcombine.low %v56_v33, %v56_v33  ;;  %v1309_v37 = vcombine.high %v56_v33, %v56_v33  ;;  %v1627_v38 = vld [vmem:[#allocation5 + $0x178] sm:$0xff]  }
  0x25   :  { %1437 = vmatpush3.bf16.msra.mxu0 %v1601_v10  ;;  %v1618_v27 = vld [vmem:[#allocation5 + $0x88] sm:$0xff]   ;;  %v1622_v31 = vld [vmem:[#allocation5 + $0x80] sm:$0xff]   ;;  %v1628_v39 = vld [vmem:[#allocation5 + $0x138] sm:$0xff]  }
  0x26   :  { %1459 = vmatpush3.bf16.msra.mxu1 %v1602_v11  ;;  %1438 = vmatprep.subr.bf16.mxu0 %v1603_v12  ;;  %v55_v32 = vld [vmem:[#allocation2] sm:$0xff]  ;;  %v1629_v40 = vld [vmem:[#allocation5 + $0x1f8] sm:$0xff]   ;;  %v1631_v42 = vld [vmem:[#allocation5 + $0x170] sm:$0xff]  }
  0x27   :  { %1460 = vmatprep.subr.bf16.mxu1 %v1604_v13  ;;  %v1306_v34 = vcombine.low %v55_v32, %v55_v32  ;;  %v1307_v35 = vcombine.high %v55_v32, %v55_v32  ;;  %1079 = vmatprep.mubr.bf16.mxu1 %v1309_v37  ;;  %v1630_v41 = vld [vmem:[#allocation5 + $0x1b8] sm:$0xff]   ;;  %v1632_v43 = vld [vmem:[#allocation5 + $0x130] sm:$0xff]   ;;  %v1635_v46 = vld [vmem:[#allocation5 + $0x168] sm:$0xff]  }
  0x28   :  { %v1633_v44 = vld [vmem:[#allocation5 + $0x1f0] sm:$0xff]   ;;  %v1636_v47 = vld [vmem:[#allocation5 + $0x128] sm:$0xff]   ;;  %v1639_v50 = vld [vmem:[#allocation5 + $0x160] sm:$0xff]  }
  0x29   :  { %1439 = vmatpush3.bf16.msra.mxu0 %v1605_v14  ;;  %1039 = vmatprep.mubr.bf16.mxu0 %v1307_v35  ;;  %v1634_v45 = vld [vmem:[#allocation5 + $0x1b0] sm:$0xff]   ;;  %v1637_v48 = vld [vmem:[#allocation5 + $0x1e8] sm:$0xff]   ;;  %v1640_v51 = vld [vmem:[#allocation5 + $0x120] sm:$0xff]  }
  0x2a   :  { %1461 = vmatpush3.bf16.msra.mxu1 %v1606_v15  ;;  %1440 = vmatprep.subr.bf16.mxu0 %v1607_v16  ;;  %v1638_v49 = vld [vmem:[#allocation5 + $0x1a8] sm:$0xff]   ;;  %v1641_v52 = vld [vmem:[#allocation5 + $0x1e0] sm:$0xff]   ;;  %v1643_v54 = vld [vmem:[#allocation5 + $0x158] sm:$0xff]  }
  0x2b   :  { %1462 = vmatprep.subr.bf16.mxu1 %v1608_v17  ;;  %v1642_v53 = vld [vmem:[#allocation5 + $0x1a0] sm:$0xff]   ;;  %v1644_v55 = vld [vmem:[#allocation5 + $0x118] sm:$0xff]   ;;  %v1647_v58 = vld [vmem:[#allocation5 + $0x150] sm:$0xff]  }
  0x2c   :  { %v1645_v56 = vld [vmem:[#allocation5 + $0x1d8] sm:$0xff]   ;;  %v1648_v59 = vld [vmem:[#allocation5 + $0x110] sm:$0xff]   ;;  %v1651_v62 = vld [vmem:[#allocation5 + $0x148] sm:$0xff]  }
  0x2d   :  { %1441 = vmatpush3.bf16.msra.mxu0 %v1609_v18  ;;  %v1646_v57 = vld [vmem:[#allocation5 + $0x198] sm:$0xff]   ;;  %v1649_v60 = vld [vmem:[#allocation5 + $0x1d0] sm:$0xff]   ;;  %v1652_v63 = vld [vmem:[#allocation5 + $0x108] sm:$0xff]  }
  0x2e   :  { %1463 = vmatpush3.bf16.msra.mxu1 %v1610_v19  ;;  %1442 = vmatprep.subr.bf16.mxu0 %v1611_v20  ;;  %v1650_v61 = vld [vmem:[#allocation5 + $0x190] sm:$0xff]   ;;  %v1653_v0 = vld [vmem:[#allocation5 + $0x1c8] sm:$0xff]   ;;  %v1655_v2 = vld [vmem:[#allocation5 + $0x140] sm:$0xff]  }
  0x2f   :  { %1464 = vmatprep.subr.bf16.mxu1 %v1612_v21  ;;  %v1654_v1 = vld [vmem:[#allocation5 + $0x188] sm:$0xff]   ;;  %v1656_v3 = vld [vmem:[#allocation5 + $0x100] sm:$0xff]   ;;  %v57_v5 = vld [vmem:[#allocation2 + $0x10] sm:$0xff] }
  0x30   :  { %v1657_v4 = vld [vmem:[#allocation5 + $0x1c0] sm:$0xff]   ;;  %v1311_v6 = vcombine.high %v57_v5, %v57_v5  ;;  %v1310_v8 = vcombine.low %v57_v5, %v57_v5  ;;  %v1661_v9 = vld [vmem:[#allocation5 + $0x278] sm:$0xff]   ;;  %v1667_v16 = vld [vmem:[#allocation5 + $0x270] sm:$0xff]  }
  0x31   :  { %1443 = vmatpush3.bf16.msra.mxu0 %v1613_v22  ;;  %v1660_v7 = vld [vmem:[#allocation5 + $0x180] sm:$0xff]   ;;  %v1664_v13 = vld [vmem:[#allocation5 + $0x238] sm:$0xff]   ;;  %v1668_v17 = vld [vmem:[#allocation5 + $0x230] sm:$0xff]  }
  0x32   :  { %1465 = vmatpush3.bf16.msra.mxu1 %v1614_v23  ;;  %1444 = vmatprep.subr.bf16.mxu0 %v1615_v24  ;;  %v58_v10 = vld [vmem:[#allocation2 + $0x18] sm:$0xff]  ;;  %v1665_v14 = vld [vmem:[#allocation5 + $0x2f8] sm:$0xff]   ;;  %v1669_v18 = vld [vmem:[#allocation5 + $0x2f0] sm:$0xff]  }
  0x33   :  { %1466 = vmatprep.subr.bf16.mxu1 %v1616_v25  ;;  %v1312_v11 = vcombine.low %v58_v10, %v58_v10  ;;  %v1313_v12 = vcombine.high %v58_v10, %v58_v10  ;;  %v1666_v15 = vld [vmem:[#allocation5 + $0x2b8] sm:$0xff]   ;;  %v1670_v19 = vld [vmem:[#allocation5 + $0x2b0] sm:$0xff]   ;;  %v1671_v20 = vld [vmem:[#allocation5 + $0x268] sm:$0xff]  }
  0x34   :  { %v1672_v21 = vld [vmem:[#allocation5 + $0x228] sm:$0xff]   ;;  %v1675_v24 = vld [vmem:[#allocation5 + $0x260] sm:$0xff]   ;;  %v1683_v32 = vld [vmem:[#allocation5 + $0x250] sm:$0xff]  }
  0x35   :  { %1445 = vmatpush3.bf16.msra.mxu0 %v1617_v26  ;;  %v1673_v22 = vld [vmem:[#allocation5 + $0x2e8] sm:$0xff]   ;;  %v1676_v25 = vld [vmem:[#allocation5 + $0x220] sm:$0xff]   ;;  %v1684_v33 = vld [vmem:[#allocation5 + $0x210] sm:$0xff]  }
  0x36   :  { %1467 = vmatpush3.bf16.msra.mxu1 %v1618_v27  ;;  %1446 = vmatprep.subr.bf16.mxu0 %v1619_v28  ;;  %v1674_v23 = vld [vmem:[#allocation5 + $0x2a8] sm:$0xff]   ;;  %v1677_v26 = vld [vmem:[#allocation5 + $0x2e0] sm:$0xff]   ;;  %v1679_v28 = vld [vmem:[#allocation5 + $0x258] sm:$0xff]  }
  0x37   :  { %1468 = vmatprep.subr.bf16.mxu1 %v1620_v29  ;;  %v1678_v27 = vld [vmem:[#allocation5 + $0x2a0] sm:$0xff]   ;;  %v1680_v29 = vld [vmem:[#allocation5 + $0x218] sm:$0xff]   ;;  %v1686_v35 = vld [vmem:[#allocation5 + $0x290] sm:$0xff]  }
  0x38   :  { %v1688_v37 = vld [vmem:[#allocation5 + $0x208] sm:$0xff]  }
  0x39   :  { %1447 = vmatpush3.bf16.msra.mxu0 %v1621_v30  ;;  %v1681_v30 = vld [vmem:[#allocation5 + $0x2d8] sm:$0xff]  }
  0x3a   :  { %1469 = vmatpush3.bf16.msra.mxu1 %v1622_v31  ;;  %1476 = vmatprep.subr.bf16.mxu0 %v1627_v38  ;;  %v1682_v31 = vld [vmem:[#allocation5 + $0x298] sm:$0xff]   ;;  %v1689_v38 = vld [vmem:[#allocation5 + $0x2c8] sm:$0xff]  }
  0x3b   :  { %1498 = vmatprep.subr.bf16.mxu1 %v1629_v40  ;;  %v1691_v40 = vld [vmem:[#allocation5 + $0x240] sm:$0xff]  }
  0x3c   :  { %1040 = vmatmul.mubr.bf16.vlgmr.msra.gmra.mxu0 %v1306_v34  ;;  %v1685_v34 = vld [vmem:[#allocation5 + $0x2d0] sm:$0xff]  }
  0x3d   :  { %1080 = vmatmul.mubr.bf16.vlgmr.msra.gmra.mxu1 %v1308_v36  ;;  %1477 = vmatpush3.bf16.msra.mxu0 %v1628_v39  ;;  %v1687_v36 = vld [vmem:[#allocation5 + $0x248] sm:$0xff]  }
  0x3e   :  { %1499 = vmatpush3.bf16.msra.mxu1 %v1630_v41  ;;  %1478 = vmatprep.subr.bf16.mxu0 %v1631_v42  ;;  %v1690_v39 = vld [vmem:[#allocation5 + $0x288] sm:$0xff]   ;;  %v1692_v41 = vld [vmem:[#allocation5 + $0x200] sm:$0xff]  }
  0x3f   :  { %1500 = vmatprep.subr.bf16.mxu1 %v1633_v44  ;;  %1119 = vmatprep.mubr.bf16.mxu0 %v1311_v6  ;;  %v1693_v42 = vld [vmem:[#allocation5 + $0x2c0] sm:$0xff]  }
  0x40   :  { %1159 = vmatprep.mubr.bf16.mxu1 %v1313_v12 }
  0x41   :  { %1479 = vmatpush3.bf16.msra.mxu0 %v1632_v43  ;;  %v59_v43 = vld [vmem:[#allocation2 + $0x20] sm:$0xff] }
  0x42   :  { %1501 = vmatpush3.bf16.msra.mxu1 %v1634_v45  ;;  %1480 = vmatprep.subr.bf16.mxu0 %v1635_v46  ;;  %v1314_v44 = vcombine.low %v59_v43, %v59_v43  ;;  %v1315_v45 = vcombine.high %v59_v43, %v59_v43  ;;  %v1696_v46 = vld [vmem:[#allocation5 + $0x280] sm:$0xff]   ;;  %v1305_v43 = vld [vmem:[%s1822_s2] ss:$0 sm:$0xff] }
  0x43   :  { %1502 = vmatprep.subr.bf16.mxu1 %v1637_v48  ;;  %v60_v48 = vld [vmem:[#allocation2 + $0x28] sm:$0xff] }
  0x45   :  { %1481 = vmatpush3.bf16.msra.mxu0 %v1636_v47  ;;  %v1697_v47 = vld [vmem:[#allocation5 + $0x378] sm:$0xff]  }
  0x46   :  { %1503 = vmatpush3.bf16.msra.mxu1 %v1638_v49  ;;  %1482 = vmatprep.subr.bf16.mxu0 %v1639_v50  ;;  %v1316_v49 = vcombine.low %v60_v48, %v60_v48  ;;  %v1317_v50 = vcombine.high %v60_v48, %v60_v48 }
  0x47   :  { %1504 = vmatprep.subr.bf16.mxu1 %v1641_v52  ;;  %v1701_v52 = vld [vmem:[#allocation5 + $0x370] sm:$0xff]  }
  0x49   :  { %1483 = vmatpush3.bf16.msra.mxu0 %v1640_v51  ;;  %v1700_v51 = vld [vmem:[#allocation5 + $0x338] sm:$0xff]  }
  0x4a   :  { %1505 = vmatpush3.bf16.msra.mxu1 %v1642_v53  ;;  %1484 = vmatprep.subr.bf16.mxu0 %v1643_v54  ;;  %v1702_v53 = vld [vmem:[#allocation5 + $0x330] sm:$0xff]   ;;  %v1703_v54 = vld [vmem:[#allocation5 + $0x368] sm:$0xff]  }
  0x4b   :  { %1506 = vmatprep.subr.bf16.mxu1 %v1645_v56  ;;  %v1705_v56 = vld [vmem:[#allocation5 + $0x360] sm:$0xff]  }
  0x4d   :  { %1485 = vmatpush3.bf16.msra.mxu0 %v1644_v55  ;;  %v1704_v55 = vld [vmem:[#allocation5 + $0x328] sm:$0xff]  }
  0x4e   :  { %1507 = vmatpush3.bf16.msra.mxu1 %v1646_v57  ;;  %1486 = vmatprep.subr.bf16.mxu0 %v1647_v58  ;;  %v1706_v57 = vld [vmem:[#allocation5 + $0x320] sm:$0xff]   ;;  %v1707_v58 = vld [vmem:[#allocation5 + $0x358] sm:$0xff]  }
  0x4f   :  { %1508 = vmatprep.subr.bf16.mxu1 %v1649_v60  ;;  %v61_v60 = vld [vmem:[#allocation2 + $0x30] sm:$0xff] }
  0x51   :  { %1487 = vmatpush3.bf16.msra.mxu0 %v1648_v59  ;;  %v1708_v59 = vld [vmem:[#allocation5 + $0x318] sm:$0xff]  }
  0x52   :  { %1509 = vmatpush3.bf16.msra.mxu1 %v1650_v61  ;;  %1488 = vmatprep.subr.bf16.mxu0 %v1651_v62  ;;  %v1709_v61 = vld [vmem:[#allocation5 + $0x350] sm:$0xff]   ;;  %v1319_v62 = vcombine.high %v61_v60, %v61_v60 }
  0x53   :  { %1510 = vmatprep.subr.bf16.mxu1 %v1653_v0  ;;  %v1711_v0 = vld [vmem:[#allocation5 + $0x348] sm:$0xff]  }
  0x55   :  { %1489 = vmatpush3.bf16.msra.mxu0 %v1652_v63  ;;  %v1710_v63 = vld [vmem:[#allocation5 + $0x310] sm:$0xff]  }
  0x56   :  { %1511 = vmatpush3.bf16.msra.mxu1 %v1654_v1  ;;  %1490 = vmatprep.subr.bf16.mxu0 %v1655_v2  ;;  %v1712_v1 = vld [vmem:[#allocation5 + $0x308] sm:$0xff]   ;;  %v1713_v2 = vld [vmem:[#allocation5 + $0x340] sm:$0xff]  }
  0x57   :  { %1512 = vmatprep.subr.bf16.mxu1 %v1657_v4  ;;  %v1318_v4 = vcombine.low %v61_v60, %v61_v60 }
  0x59   :  { %1491 = vmatpush3.bf16.msra.mxu0 %v1656_v3  ;;  %v1714_v3 = vld [vmem:[#allocation5 + $0x300] sm:$0xff]  }
  0x5a   :  { %1513 = vmatpush3.bf16.msra.mxu1 %v1660_v7  ;;  %1520 = vmatprep.subr.bf16.mxu0 %v1661_v9 }
  0x5b   :  { %1542 = vmatprep.subr.bf16.mxu1 %v1665_v14 }
  0x5c   :  { %1120 = vmatmul.mubr.bf16.vlgmr.msra.gmra.mxu0 %v1310_v8 }
  0x5d   :  { %1521 = vmatpush3.bf16.msra.mxu0 %v1664_v13  ;;  %1160 = vmatmul.mubr.bf16.vlgmr.msra.gmra.mxu1 %v1312_v11 }
  0x5e   :  { %1543 = vmatpush3.bf16.msra.mxu1 %v1666_v15  ;;  %1522 = vmatprep.subr.bf16.mxu0 %v1667_v16 }
  0x5f   :  { %1544 = vmatprep.subr.bf16.mxu1 %v1669_v18  ;;  %1199 = vmatprep.mubr.bf16.mxu0 %v1315_v45 }
  0x60   :  { %1239 = vmatprep.mubr.bf16.mxu1 %v1317_v50 }
  0x61   :  { %1523 = vmatpush3.bf16.msra.mxu0 %v1668_v17 }
  0x62   :  { %1545 = vmatpush3.bf16.msra.mxu1 %v1670_v19  ;;  %1524 = vmatprep.subr.bf16.mxu0 %v1671_v20 }
  0x63   :  { %1546 = vmatprep.subr.bf16.mxu1 %v1673_v22 }
  0x65   :  { %1525 = vmatpush3.bf16.msra.mxu0 %v1672_v21 }
  0x66   :  { %1547 = vmatpush3.bf16.msra.mxu1 %v1674_v23  ;;  %1526 = vmatprep.subr.bf16.mxu0 %v1675_v24 }
  0x67   :  { %1548 = vmatprep.subr.bf16.mxu1 %v1677_v26 }
  0x69   :  { %1527 = vmatpush3.bf16.msra.mxu0 %v1676_v25 }
  0x6a   :  { %1549 = vmatpush3.bf16.msra.mxu1 %v1678_v27  ;;  %1528 = vmatprep.subr.bf16.mxu0 %v1679_v28 }
  0x6b   :  { %1550 = vmatprep.subr.bf16.mxu1 %v1681_v30 }
  0x6d   :  { %1529 = vmatpush3.bf16.msra.mxu0 %v1680_v29 }
  0x6e   :  { %1551 = vmatpush3.bf16.msra.mxu1 %v1682_v31  ;;  %1530 = vmatprep.subr.bf16.mxu0 %v1683_v32 }
  0x6f   :  { %1552 = vmatprep.subr.bf16.mxu1 %v1685_v34 }
  0x71   :  { %1531 = vmatpush3.bf16.msra.mxu0 %v1684_v33 }
  0x72   :  { %1553 = vmatpush3.bf16.msra.mxu1 %v1686_v35  ;;  %1532 = vmatprep.subr.bf16.mxu0 %v1687_v36 }
  0x73   :  { %1554 = vmatprep.subr.bf16.mxu1 %v1689_v38 }
  0x75   :  { %1533 = vmatpush3.bf16.msra.mxu0 %v1688_v37 }
  0x76   :  { %1555 = vmatpush3.bf16.msra.mxu1 %v1690_v39  ;;  %1534 = vmatprep.subr.bf16.mxu0 %v1691_v40 }
  0x77   :  { %1556 = vmatprep.subr.bf16.mxu1 %v1693_v42 }
  0x79   :  { %1535 = vmatpush3.bf16.msra.mxu0 %v1692_v41 }
  0x7a   :  { %1557 = vmatpush3.bf16.msra.mxu1 %v1696_v46  ;;  %1564 = vmatprep.subr.bf16.mxu0 %v1697_v47 }
  0x7c   :  { %1200 = vmatmul.mubr.bf16.vlgmr.msra.gmra.mxu0 %v1314_v44 }
  0x7d   :  { %1565 = vmatpush3.bf16.msra.mxu0 %v1700_v51  ;;  %1240 = vmatmul.mubr.bf16.vlgmr.msra.gmra.mxu1 %v1316_v49 }
  0x7e   :  { %1566 = vmatprep.subr.bf16.mxu0 %v1701_v52  ;;  %1279 = vmatprep.mubr.bf16.mxu0 %v1319_v62 }
  0x81   :  { %1567 = vmatpush3.bf16.msra.mxu0 %v1702_v53 }
  0x82   :  { %1568 = vmatprep.subr.bf16.mxu0 %v1703_v54 }
  0x85   :  { %1569 = vmatpush3.bf16.msra.mxu0 %v1704_v55 }
  0x86   :  { %1570 = vmatprep.subr.bf16.mxu0 %v1705_v56 }
  0x89   :  { %1571 = vmatpush3.bf16.msra.mxu0 %v1706_v57 }
  0x8a   :  { %1572 = vmatprep.subr.bf16.mxu0 %v1707_v58 }
  0x8d   :  { %1573 = vmatpush3.bf16.msra.mxu0 %v1708_v59 }
  0x8e   :  { %1574 = vmatprep.subr.bf16.mxu0 %v1709_v61 }
  0x91   :  { %1575 = vmatpush3.bf16.msra.mxu0 %v1710_v63 }
  0x92   :  { %1576 = vmatprep.subr.bf16.mxu0 %v1711_v0 }
  0x95   :  { %1577 = vmatpush3.bf16.msra.mxu0 %v1712_v1 }
  0x96   :  { %1578 = vmatprep.subr.bf16.mxu0 %v1713_v2 }
  0x99   :  { %1579 = vmatpush3.bf16.msra.mxu0 %v1714_v3 }
  0x9c   :  { %1280 = vmatmul.mubr.bf16.vlgmr.msra.gmra.mxu0 %v1318_v4 }
  0xfc   :  { %v1448_v5 = vpop.f32.mrf.mxu0 }
  0xfd   :  { %v1470_v6 = vpop.f32.mrf.mxu1 }
  0xfe   :  { %v1449_v7 = vpop.f32.mrf.mxu0 }
  0xff   :  { %v1471_v8 = vpop.f32.mrf.mxu1  ;;  %v1450_v9 = vadd.f32 %v1449_v7, %v1448_v5 }
 0x100   :  { %v1472_v10 = vadd.f32 %v1471_v8, %v1470_v6  ;;  %v1451_v11 = vpop.f32.mrf.mxu0 }
 0x101   :  { %v1473_v12 = vpop.f32.mrf.mxu1 }
 0x102   :  { %v1082_v13 = vadd.f32 %v1472_v10, %v1450_v9  ;;  %v1452_v14 = vpop.f32.mrf.mxu0 }
 0x103   :  { %v1474_v15 = vpop.f32.mrf.mxu1 }
 0x11c   :  { %v1492_v16 = vpop.f32.mrf.mxu0 }
 0x11d   :  { %v1514_v17 = vpop.f32.mrf.mxu1 }
 0x11e   :  { %v1493_v18 = vpop.f32.mrf.mxu0 }
 0x11f   :  { %v1515_v19 = vpop.f32.mrf.mxu1  ;;  %v1494_v32 = vadd.f32 %v1493_v18, %v1492_v16 }
 0x120   :  { %v1495_v20 = vpop.f32.mrf.mxu0  ;;  %v1516_v34 = vadd.f32 %v1515_v19, %v1514_v17 }
 0x121   :  { %v1517_v21 = vpop.f32.mrf.mxu1  ;;  %v1122_v33 = vadd.f32 %v1494_v32, %v1082_v13 }
 0x122   :  { %v1496_v22 = vpop.f32.mrf.mxu0 }
 0x123   :  { %v1518_v23 = vpop.f32.mrf.mxu1  ;;  %v1162_v36 = vadd.f32 %v1516_v34, %v1122_v33 }
 0x13c   :  { %v1536_v24 = vpop.f32.mrf.mxu0 }
 0x13d   :  { %v1558_v26 = vpop.f32.mrf.mxu1 }
 0x13e   :  { %v1537_v25 = vpop.f32.mrf.mxu0 }
 0x13f   :  { %v1559_v28 = vpop.f32.mrf.mxu1  ;;  %v1538_v35 = vadd.f32 %v1537_v25, %v1536_v24 }
 0x140   :  { %v1539_v27 = vpop.f32.mrf.mxu0  ;;  %v1560_v38 = vadd.f32 %v1559_v28, %v1558_v26 }
 0x141   :  { %v1561_v30 = vpop.f32.mrf.mxu1  ;;  %v1202_v37 = vadd.f32 %v1538_v35, %v1162_v36 }
 0x142   :  { %v1540_v29 = vpop.f32.mrf.mxu0 }
 0x143   :  { %v1562_v31 = vpop.f32.mrf.mxu1  ;;  %v1242_v41 = vadd.f32 %v1560_v38, %v1202_v37 }
 0x15c   :  { %v1580_v39 = vpop.f32.mrf.mxu0 }
 0x15e   :  { %v1581_v40 = vpop.f32.mrf.mxu0 }
 0x15f   :  { %v1582_v42 = vadd.f32 %v1581_v40, %v1580_v39 }
 0x160   :  { %v1583_v44 = vpop.f32.mrf.mxu0 }
 0x161   :  { %v1282_v45 = vadd.f32 %v1582_v42, %v1242_v41 }
 0x162   :  { %v1584_v46 = vpop.f32.mrf.mxu0 }
 0x163   :  { %v1287_v47 = vadd.f32 %v1305_v43, %v1282_v45 }
 0x165   :  { %1288 = vst [vmem:[#allocation7] sm:$0xff] %v1287_v47 }
 0x166   :  { %1768 = shalt.err (!%p1765_p0)
}
 0x167   :  { %1298 = dma.vmem_to_hbm [thread:$0]  %s1296_s25, 128, %s1823_s3, [#allocation4]  }
 0x168   :  { %1781 = dma.done.wait [#allocation4], 128  }
 0x169   :  { %1782 = vsyncadd [#allocation4], 4294967168 }
 0x16a   :  { %1302 = vsyncpa [#allocation3], 1 }
 0x16b   :  { %1303 = vsyncpa [#allocation6], 1 }
 0x16c   :  { %1304 = vsyncpa [#allocation4], 1 }

</bundles_post_ra>
